<compile_context>
chip_gen: v7x
topology: tpu7x:2x2x1
jax: 0.10.0
libtpu: 0.0.40
codegen_flags: <defaults>
</compile_context>

<pallas_src>
import jax
import jax.numpy as jnp
from jax.experimental import pallas as pl
from jax.experimental.pallas import tpu as pltpu

_LANE = 128          # lane width (last dim)
_SUBLANE_BF16 = 16   # bf16 sublane tile (second-to-last dim)


def _round_up(n, m):
    return ((n + m - 1) // m) * m


def _pick_tile(total, max_tile, multiple):
    """Largest divisor of `total` that is a multiple of `multiple` and <= max_tile."""
    max_tile = max(multiple, min(max_tile, total))
    best = multiple
    for cand in range(multiple, max_tile + 1, multiple):
        if total % cand == 0:
            best = cand
    return best


def classifier_kernel_fused(x_ref, t_ref, wi_ref, wt_ref, b_ref, o_ref):
    # Single-K-tile path: weights fully resident, one MXU dot per batch tile.
    # x_ref : (tb, D)   bf16 image tile
    # t_ref : (tb, 1)   f32 timestep column
    # wi_ref: (D, Cp)   bf16 image weights (resident)
    # wt_ref: (1, Cp)   f32 t-weight row (resident)
    # b_ref : (1, Cp)   f32 folded bias (resident)
    acc = jnp.dot(x_ref[...], wi_ref[...], preferred_element_type=jnp.float32)
    o_ref[...] = (acc + t_ref[...] * wt_ref[...] + b_ref[...]).astype(o_ref.dtype)


def classifier_kernel_ktiled(x_ref, t_ref, wi_ref, wt_ref, b_ref, o_ref):
    # K-tiled reduction: accumulate directly into the f32 output block, which
    # is VMEM-resident across the reduction axis (constant out index over k).
    k = pl.program_id(1)

    @pl.when(k == 0)
    def _init():
        o_ref[...] = jnp.zeros_like(o_ref)

    o_ref[...] += jnp.dot(x_ref[...], wi_ref[...],
                          preferred_element_type=jnp.float32)

    @pl.when(k == pl.num_programs(1) - 1)
    def _finalize():
        # Rank-1 t-term on the VPU (broadcast (tb,1)*(1,Cp)); bias pre-folded.
        o_ref[...] += t_ref[...] * wt_ref[...] + b_ref[...]


def classifier_forward(x, t, w_img, b_img, w_t, b_t, *,
                       block_b=512, block_d=2048):
    """Equivalent of Classifier.forward(x, t).

    x     : (B, C_in, H, W)
    t     : (B,) or (B, 1), any numeric dtype (cast like t.float())
    w_img : (D, num_classes)       -- torch weight.T, D = C_in*H*W
    b_img : (num_classes,)
    w_t   : (t_dim=1, num_classes) -- torch weight.T
    b_t   : (num_classes,)
    returns logits (B, num_classes) float32
    """
    B = x.shape[0]
    x_flat = x.reshape(B, -1)                      # NCHW flatten, like torch .view
    D = x_flat.shape[1]
    C = w_img.shape[1]

    # ---- lane / sublane rounding and tile selection --------------------------
    C_pad = _round_up(C, _LANE)                    # lane-dense weights / output
    D_pad = _round_up(D, _LANE)
    B_pad = _round_up(B, _SUBLANE_BF16)

    tb = _pick_tile(B_pad, block_b, _SUBLANE_BF16)
    nb = B_pad // tb
    if nb < 2 and B_pad >= 2 * _SUBLANE_BF16:
        # Ensure >=2 batch tiles so v7x's 2 TensorCores both get work.
        tb = _pick_tile(B_pad, B_pad // 2, _SUBLANE_BF16)
        nb = B_pad // tb

    td = _pick_tile(D_pad, block_d, _LANE)
    nk = D_pad // td

    # ---- operands: bf16 matmul stream, f32 t/bias path, minimal padding ------
    x_bf = x_flat.astype(jnp.bfloat16)
    if B_pad != B or D_pad != D:
        x_bf = jnp.pad(x_bf, ((0, B_pad - B), (0, D_pad - D)))

    t_col = t.reshape(B, 1).astype(jnp.float32)
    if B_pad != B:
        t_col = jnp.pad(t_col, ((0, B_pad - B), (0, 0)))

    wi_bf = w_img.astype(jnp.bfloat16)
    if D_pad != D or C_pad != C:
        wi_bf = jnp.pad(wi_bf, ((0, D_pad - D), (0, C_pad - C)))

    wt_row = w_t.reshape(1, C).astype(jnp.float32)
    bias = (b_img.astype(jnp.float32) + b_t.astype(jnp.float32)).reshape(1, C)
    if C_pad != C:
        wt_row = jnp.pad(wt_row, ((0, 0), (0, C_pad - C)))
        bias = jnp.pad(bias, ((0, 0), (0, C_pad - C)))

    # Weight is re-streamed per batch tile only when the K axis is tiled.
    weight_reads = 1 if nk == 1 else nb
    cost = pl.CostEstimate(
        flops=2 * B_pad * D_pad * C_pad + 3 * B_pad * C_pad,
        transcendentals=0,
        bytes_accessed=(2 * B_pad * D_pad                      # x (bf16)
                        + 2 * weight_reads * D_pad * C_pad     # w_img (bf16)
                        + 4 * B_pad * C_pad                    # logits (f32)
                        + 4 * B_pad + 8 * C_pad),              # t, wt, bias
    )

    if nk == 1:
        kernel = classifier_kernel_fused
        dims = ("parallel",)
        grid_spec = pltpu.PrefetchScalarGridSpec(
            num_scalar_prefetch=0,
            grid=(nb,),
            in_specs=[
                pl.BlockSpec((tb, D_pad), lambda i: (i, 0)),     # x row tile
                pl.BlockSpec((tb, 1), lambda i: (i, 0)),         # t column
                pl.BlockSpec((D_pad, C_pad), lambda i: (0, 0)),  # w_img resident
                pl.BlockSpec((1, C_pad), lambda i: (0, 0)),      # w_t resident
                pl.BlockSpec((1, C_pad), lambda i: (0, 0)),      # bias resident
            ],
            out_specs=pl.BlockSpec((tb, C_pad), lambda i: (i, 0)),
        )
    else:
        kernel = classifier_kernel_ktiled
        dims = ("parallel", "arbitrary")
        grid_spec = pltpu.PrefetchScalarGridSpec(
            num_scalar_prefetch=0,
            grid=(nb, nk),
            in_specs=[
                pl.BlockSpec((tb, td), lambda i, k: (i, k)),       # x tile
                pl.BlockSpec((tb, 1), lambda i, k: (i, 0)),        # t column
                pl.BlockSpec((td, C_pad), lambda i, k: (k, 0)),    # w_img K-slice
                pl.BlockSpec((1, C_pad), lambda i, k: (0, 0)),     # w_t row
                pl.BlockSpec((1, C_pad), lambda i, k: (0, 0)),     # folded bias
            ],
            out_specs=pl.BlockSpec((tb, C_pad), lambda i, k: (i, 0)),
        )

    out = pl.pallas_call(
        kernel,
        out_shape=jax.ShapeDtypeStruct((B_pad, C_pad), jnp.float32),
        grid_spec=grid_spec,
        compiler_params=pltpu.CompilerParams(dimension_semantics=dims),
        cost_estimate=cost,
    )(x_bf, t_col, wi_bf, wt_row, bias)

    return out[:B, :C]


if __name__ == "__main__":
    # Small shapes consistent with Classifier.__init__
    image_size = 16
    n_channels = 3
    num_classes = 10
    t_dim = 1
    B = 2
    D = image_size * image_size * n_channels  # 768

    key = jax.random.PRNGKey(0)
    kx, kt, kwi, kbi, kwt, kbt = jax.random.split(key, 6)

    x = jax.random.normal(kx, (B, n_channels, image_size, image_size), jnp.float32)
    t = jax.random.randint(kt, (B,), 0, 1000).astype(jnp.int32)

    # Parameters (torch.nn.Linear weights, stored pre-transposed as W.T)
    w_img = jax.random.normal(kwi, (D, num_classes), jnp.float32) * 0.02
    b_img = jax.random.normal(kbi, (num_classes,), jnp.float32) * 0.02
    w_t = jax.random.normal(kwt, (t_dim, num_classes), jnp.float32) * 0.02
    b_t = jax.random.normal(kbt, (num_classes,), jnp.float32) * 0.02

    logits = classifier_forward(x, t, w_img, b_img, w_t, b_t)
    logits = jax.block_until_ready(logits)

    # Pure-JAX (f32) reference check; tolerance loosened for bf16 matmul operands.
    ref = (x.reshape(B, -1) @ w_img + b_img) + \
          (t.reshape(B, 1).astype(jnp.float32) @ w_t + b_t)
    assert logits.shape == (B, num_classes)
    assert jnp.allclose(logits, ref, atol=2e-2, rtol=2e-2)

    print("KERNEL_OK")
</pallas_src>

<mosaic_0001>
module attributes {stable_mosaic.version = 11 : i64} {
  func.func @classifier_kernel_fused(%arg0: i32, %arg1: memref<16x768xbf16, #tpu.memory_space<vmem>>, %arg2: memref<16x1xf32, #tpu.memory_space<vmem>>, %arg3: memref<768x128xbf16, #tpu.memory_space<vmem>>, %arg4: memref<1x128xf32, #tpu.memory_space<vmem>>, %arg5: memref<1x128xf32, #tpu.memory_space<vmem>>, %arg6: memref<16x128xf32, #tpu.memory_space<vmem>>) attributes {dimension_semantics = [#tpu.dimension_semantics<parallel>], iteration_bounds = array<i64: 1>, scalar_prefetch = 0 : i64, scratch_operands = 0 : i64, tpu.core_type = #tpu.core_type<tc>, window_params = [{transform_indices = @transform_0, window_bounds = array<i64: 16, 768>}, {transform_indices = @transform_1, window_bounds = array<i64: 16, 1>}, {pipeline_mode = #tpu.pipeline_mode<synchronous>, transform_indices = @transform_2, window_bounds = array<i64: 768, 128>}, {pipeline_mode = #tpu.pipeline_mode<synchronous>, transform_indices = @transform_3, window_bounds = array<i64: 1, 128>}, {pipeline_mode = #tpu.pipeline_mode<synchronous>, transform_indices = @transform_4, window_bounds = array<i64: 1, 128>}, {transform_indices = @transform_5, window_bounds = array<i64: 16, 128>}]} {
    %c0 = arith.constant 0 : index
    %c0_0 = arith.constant 0 : index
    %0 = vector.load %arg1[%c0, %c0_0] : memref<16x768xbf16, #tpu.memory_space<vmem>>, vector<16x768xbf16>
    %c0_1 = arith.constant 0 : index
    %c0_2 = arith.constant 0 : index
    %1 = vector.load %arg3[%c0_1, %c0_2] : memref<768x128xbf16, #tpu.memory_space<vmem>>, vector<768x128xbf16>
    %cst = arith.constant dense<0.000000e+00> : vector<16x128xf32>
    %2 = tpu.matmul %0, %1, %cst {dimension_numbers = #tpu.dot_dimension_numbers<[1], [0], [0], [1], [0, 0, 1, 1], [], []>} : vector<16x768xbf16>, vector<768x128xbf16>, vector<16x128xf32> -> vector<16x128xf32>
    %c0_3 = arith.constant 0 : index
    %c0_4 = arith.constant 0 : index
    %3 = vector.load %arg2[%c0_3, %c0_4] : memref<16x1xf32, #tpu.memory_space<vmem>>, vector<16x1xf32>
    %c0_5 = arith.constant 0 : index
    %c0_6 = arith.constant 0 : index
    %4 = vector.load %arg4[%c0_5, %c0_6] : memref<1x128xf32, #tpu.memory_space<vmem>>, vector<1x128xf32>
    %5 = vector.broadcast %3 : vector<16x1xf32> to vector<16x128xf32>
    %6 = vector.broadcast %4 : vector<1x128xf32> to vector<16x128xf32>
    %7 = arith.mulf %5, %6 : vector<16x128xf32>
    %8 = arith.addf %2, %7 : vector<16x128xf32>
    %c0_7 = arith.constant 0 : index
    %c0_8 = arith.constant 0 : index
    %9 = vector.load %arg5[%c0_7, %c0_8] : memref<1x128xf32, #tpu.memory_space<vmem>>, vector<1x128xf32>
    %10 = vector.broadcast %9 : vector<1x128xf32> to vector<16x128xf32>
    %11 = arith.addf %8, %10 : vector<16x128xf32>
    %c0_9 = arith.constant 0 : index
    %c0_10 = arith.constant 0 : index
    %12 = vector.load %arg6[%c0_9, %c0_10] : memref<16x128xf32, #tpu.memory_space<vmem>>, vector<16x128xf32>
    tpu.vector_store %arg6[%c0_9, %c0_10], %11 {strides = array<i32>} : memref<16x128xf32, #tpu.memory_space<vmem>>, vector<16x128xf32>,
    return
  }
  func.func @transform_0(%arg0: i32) -> (i32, i32) {
    %c0_i32 = arith.constant 0 : i32
    %c0_i32_0 = arith.constant 0 : i32
    return %arg0, %c0_i32 : i32, i32
  }
  func.func @transform_1(%arg0: i32) -> (i32, i32) {
    %c0_i32 = arith.constant 0 : i32
    %c0_i32_0 = arith.constant 0 : i32
    return %arg0, %c0_i32 : i32, i32
  }
  func.func @transform_2(%arg0: i32) -> (i32, i32) {
    %c0_i32 = arith.constant 0 : i32
    %c0_i32_0 = arith.constant 0 : i32
    %c0_i32_1 = arith.constant 0 : i32
    return %c0_i32, %c0_i32_0 : i32, i32
  }
  func.func @transform_3(%arg0: i32) -> (i32, i32) {
    %c0_i32 = arith.constant 0 : i32
    %c0_i32_0 = arith.constant 0 : i32
    %c0_i32_1 = arith.constant 0 : i32
    return %c0_i32, %c0_i32_0 : i32, i32
  }
  func.func @transform_4(%arg0: i32) -> (i32, i32) {
    %c0_i32 = arith.constant 0 : i32
    %c0_i32_0 = arith.constant 0 : i32
    %c0_i32_1 = arith.constant 0 : i32
    return %c0_i32, %c0_i32_0 : i32, i32
  }
  func.func @transform_5(%arg0: i32) -> (i32, i32) {
    %c0_i32 = arith.constant 0 : i32
    %c0_i32_0 = arith.constant 0 : i32
    return %arg0, %c0_i32 : i32, i32
  }
}

</mosaic_0001>

<bundles_post_ra>
// kernel: tpu_custom_call.1
= control target key start
LH: loop header
LB: loop body
LE: loop exit
PB: predicated region body
PF: predicated region fallthrough
CT: control target
= control target key end

     0   :  { %10 = vsyncpa [#allocation3], 0  ;;  %s993_s0 = inlined_call_operand.hbm [shape: bf16[16,768], index: 0, kind: input, shape index: {}]   ;;  %s994_s1 = inlined_call_operand.vmem [shape: f32[16,1], index: 1, kind: input, shape index: {}]   ;;  %s995_s2 = inlined_call_operand.hbm [shape: bf16[768,128], index: 2, kind: input, shape index: {}]   ;;  %s996_s3 = inlined_call_operand.vmem [shape: f32[1,128], index: 3, kind: input, shape index: {}]   ;;  %s997_s4 = inlined_call_operand.vmem [shape: f32[1,128], index: 4, kind: input, shape index: {}]   ;;  %s998_s5 = inlined_call_operand.hbm [shape: f32[16,128], index: 5, kind: output, shape index: {}]  }
   0x1   :  { %11 = vsyncpa [#allocation6], 0 }
   0x2   :  { %12 = vsyncpa [#allocation4], 0  ;;  %s905_s18 = smov [#allocation2]   ;;  %s833_s22 = scalar_lea.hbm %s993_s0, 768 }
   0x3   :  { %s18_s19 = sshll.u32 %s905_s18, 4  ;;  %p834_p0 = scmp.ne.s32.totalorder %s993_s0, %s833_s22  ;;  %s19_s19 = int_to_ptr.vmem [resolvable:$true] %s18_s19 }
   0x4   :  { %p837_p1 = scmp.lt.u32.totalorder %s833_s22, %s993_s0 }
   0x6   :  { %p839_p2 = pnand %p837_p1, %p834_p0 }
   0x8   :  { %842 = shalt.err (!%p839_p2)
}
   0x9   :  { %s843_s27 = scalar_lea.vmem %s19_s19, 768  ;;  %p848_p4 = scmp.lt.s32.totalorder %s19_s19, %s19_s19 }
   0xa   :  { %p844_p3 = scmp.ne.s32.totalorder %s19_s19, %s843_s27  ;;  %p849_p5 = scmp.lt.s32.totalorder %s843_s27, %s843_s27 }
   0xc   :  { %p850_p6 = por %p849_p5, %p848_p4 }
   0xe   :  { %p851_p7 = pnand %p850_p6, %p844_p3 }
  0x10   :  { %854 = shalt.err (!%p851_p7)
}
  0x11   :  { %s906_s28 = smov 384   ;;  %s907_s29 = smov 24  }
  0x12   :  { %24 = dma.hbm_to_vmem [thread:$0]  %s993_s0, 768, %s19_s19, [#allocation3], %s906_s28, %s906_s28, %s907_s29  }
  0x13   :  { %s908_s7 = smov [#allocation5]   ;;  %s855_s11 = scalar_lea.hbm %s995_s2, 6144 }
  0x14   :  { %s32_s8 = sshll.u32 %s908_s7, 4  ;;  %p856_p8 = scmp.ne.s32.totalorder %s995_s2, %s855_s11  ;;  %s33_s8 = int_to_ptr.vmem [resolvable:$true] %s32_s8 }
  0x15   :  { %p859_p9 = scmp.lt.u32.totalorder %s855_s11, %s995_s2 }
  0x17   :  { %p861_p10 = pnand %p859_p9, %p856_p8 }
  0x19   :  { %864 = shalt.err (!%p861_p10)
}
  0x1a   :  { %s865_s16 = scalar_lea.vmem %s33_s8, 6144  ;;  %p870_p12 = scmp.lt.s32.totalorder %s33_s8, %s33_s8 }
  0x1b   :  { %p866_p11 = scmp.ne.s32.totalorder %s33_s8, %s865_s16  ;;  %p871_p13 = scmp.lt.s32.totalorder %s865_s16, %s865_s16 }
  0x1d   :  { %p872_p0 = por %p871_p13, %p870_p12 }
  0x1f   :  { %p873_p1 = pnand %p872_p0, %p866_p11 }
  0x21   :  { %876 = shalt.err (!%p873_p1)
}
  0x22   :  { %s909_s0 = smov 64   ;;  %s910_s17 = smov 4  }
  0x23   :  { %38 = dma.hbm_to_vmem [thread:$0]  %s995_s2, 6144, %s33_s8, [#allocation6], %s909_s0, %s909_s0, %s910_s17  }
  0x24   :  { %899 = dma.done.wait [#allocation3], 768  }
  0x25   :  { %900 = vsyncadd [#allocation3], 4294966528 }
  0x26   :  { %901 = dma.done.wait [#allocation6], 6144  }
  0x27   :  { %902 = vsyncadd [#allocation6], 4294961152  ;;  %v911_v0 = vmov 0   ;;  %v776_v1 = vld [vmem:[#allocation5 + $0x40] sm:$0xff]   ;;  %v780_v5 = vld [vmem:[#allocation5 + $0x48] sm:$0xff]   ;;  %s912_s25 = smov [#allocation7]  }
  0x28   :  { %775 = vset.pattern.permute.xlu0 %v911_v0  ;;  %v777_v2 = vld [vmem:[#allocation5] sm:$0xff]   ;;  %699 = vmatprep.subr.bf16.mxu0 %v776_v1  ;;  %v781_v6 = vld [vmem:[#allocation5 + $0x8] sm:$0xff]   ;;  %v784_v9 = vld [vmem:[#allocation5 + $0x50] sm:$0xff]   ;;  %s630_s26 = sshll.u32 %s912_s25, 4  ;;  %s631_s26 = int_to_ptr.vmem [resolvable:$true] %s630_s26 }
  0x29   :  { %v778_v3 = vld [vmem:[#allocation5 + $0xc0] sm:$0xff]   ;;  %700 = vmatpush3.bf16.msra.mxu0 %v777_v2  ;;  %v782_v7 = vld [vmem:[#allocation5 + $0xc8] sm:$0xff]   ;;  %v785_v10 = vld [vmem:[#allocation5 + $0x10] sm:$0xff]   ;;  %s877_s27 = scalar_lea.vmem %s631_s26, 256  ;;  %p882_p3 = scmp.lt.s32.totalorder %s631_s26, %s631_s26 }
  0x2a   :  { %v779_v4 = vld [vmem:[#allocation5 + $0x80] sm:$0xff]   ;;  %721 = vmatprep.subr.bf16.mxu1 %v778_v3  ;;  %701 = vmatprep.subr.bf16.mxu0 %v780_v5  ;;  %v783_v8 = vld [vmem:[#allocation5 + $0x88] sm:$0xff]   ;;  %v786_v11 = vld [vmem:[#allocation5 + $0xd0] sm:$0xff]   ;;  %p878_p2 = scmp.ne.s32.totalorder %s631_s26, %s877_s27  ;;  %p883_p4 = scmp.lt.s32.totalorder %s877_s27, %s877_s27 }
  0x2b   :  { %722 = vmatpush3.bf16.msra.mxu1 %v779_v4  ;;  %v787_v12 = vld [vmem:[#allocation5 + $0x90] sm:$0xff]   ;;  %v788_v13 = vld [vmem:[#allocation5 + $0x58] sm:$0xff]   ;;  %v792_v17 = vld [vmem:[#allocation5 + $0x60] sm:$0xff]  }
  0x2c   :  { %723 = vmatprep.subr.bf16.mxu1 %v782_v7  ;;  %v789_v14 = vld [vmem:[#allocation5 + $0x18] sm:$0xff]   ;;  %v793_v18 = vld [vmem:[#allocation5 + $0x20] sm:$0xff]   ;;  %v796_v21 = vld [vmem:[#allocation5 + $0x68] sm:$0xff]   ;;  %p884_p5 = por %p883_p4, %p882_p3 }
  0x2d   :  { %702 = vmatpush3.bf16.msra.mxu0 %v781_v6  ;;  %v790_v15 = vld [vmem:[#allocation5 + $0xd8] sm:$0xff]   ;;  %v794_v19 = vld [vmem:[#allocation5 + $0xe0] sm:$0xff]   ;;  %v797_v22 = vld [vmem:[#allocation5 + $0x28] sm:$0xff]  }
  0x2e   :  { %703 = vmatprep.subr.bf16.mxu0 %v784_v9  ;;  %v791_v16 = vld [vmem:[#allocation5 + $0x98] sm:$0xff]   ;;  %v795_v20 = vld [vmem:[#allocation5 + $0xa0] sm:$0xff]   ;;  %v798_v23 = vld [vmem:[#allocation5 + $0xe8] sm:$0xff]   ;;  %p885_p6 = pnand %p884_p5, %p878_p2 }
  0x2f   :  { %724 = vmatpush3.bf16.msra.mxu1 %v783_v8  ;;  %v799_v24 = vld [vmem:[#allocation5 + $0xa8] sm:$0xff]   ;;  %v800_v25 = vld [vmem:[#allocation5 + $0x70] sm:$0xff]   ;;  %v804_v29 = vld [vmem:[#allocation5 + $0x78] sm:$0xff]  }
  0x30   :  { %725 = vmatprep.subr.bf16.mxu1 %v786_v11  ;;  %v801_v26 = vld [vmem:[#allocation5 + $0x30] sm:$0xff]   ;;  %v805_v30 = vld [vmem:[#allocation5 + $0x38] sm:$0xff]   ;;  %v811_v35 = vld [vmem:[#allocation5 + $0x140] sm:$0xff]  }
  0x31   :  { %704 = vmatpush3.bf16.msra.mxu0 %v785_v10  ;;  %v802_v27 = vld [vmem:[#allocation5 + $0xf0] sm:$0xff]   ;;  %v806_v31 = vld [vmem:[#allocation5 + $0xf8] sm:$0xff]   ;;  %v815_v38 = vld [vmem:[#allocation5 + $0x100] sm:$0xff]  }
  0x32   :  { %705 = vmatprep.subr.bf16.mxu0 %v788_v13  ;;  %v803_v28 = vld [vmem:[#allocation5 + $0xb0] sm:$0xff]   ;;  %v810_v34 = vld [vmem:[#allocation5 + $0xb8] sm:$0xff]   ;;  %v816_v39 = vld [vmem:[#allocation5 + $0x148] sm:$0xff]  }
  0x33   :  { %726 = vmatpush3.bf16.msra.mxu1 %v787_v12  ;;  %v807_v32 = vld [vmem:[#allocation2] ss:$24 sps:$4 sm:$0xff]   ;;  %v809_v33 = vld [vmem:[#allocation2 + $0x4] ss:$24 sps:$4 sm:$0xff]   ;;  %v820_v43 = vld [vmem:[#allocation5 + $0x158] sm:$0xff]  }
  0x34   :  { %727 = vmatprep.subr.bf16.mxu1 %v790_v15  ;;  %523 = vmatprep.mubr.bf16.mxu0 %v809_v33  ;;  %v812_v36 = vld [vmem:[#allocation2 + $0x8] ss:$24 sps:$4 sm:$0xff]   ;;  %v814_v37 = vld [vmem:[#allocation2 + $0xc] ss:$24 sps:$4 sm:$0xff]   ;;  %v817_v40 = vld [vmem:[#allocation5 + $0x108] sm:$0xff]  }
  0x35   :  { %706 = vmatpush3.bf16.msra.mxu0 %v789_v14  ;;  %564 = vmatprep.mubr.bf16.mxu1 %v814_v37  ;;  %v818_v41 = vld [vmem:[#allocation5 + $0x150] sm:$0xff]   ;;  %v821_v44 = vld [vmem:[#allocation5 + $0x118] sm:$0xff]   ;;  %v822_v45 = vld [vmem:[#allocation5 + $0x160] sm:$0xff]  }
  0x36   :  { %707 = vmatprep.subr.bf16.mxu0 %v792_v17  ;;  %v819_v42 = vld [vmem:[#allocation5 + $0x110] sm:$0xff]   ;;  %v823_v46 = vld [vmem:[#allocation5 + $0x120] sm:$0xff]   ;;  %v824_v47 = vld [vmem:[#allocation5 + $0x168] sm:$0xff]  }
  0x37   :  { %728 = vmatpush3.bf16.msra.mxu1 %v791_v16  ;;  %v832_v48 = vld [vmem:[#allocation2 + $0x14] ss:$24 sps:$4 sm:$0xff]   ;;  %v152_v49 = vld [vmem:[%s994_s1] sm:$0xff]  ;;  %v825_v50 = vld [vmem:[#allocation5 + $0x128] sm:$0xff]  }
  0x38   :  { %729 = vmatprep.subr.bf16.mxu1 %v794_v19  ;;  %157 = vperm.xlu0 %775, %v152_v49   ;;  %v153_v51 = vld [vmem:[%s994_s1 + $0x8] sm:$0xff]  ;;  %v826_v52 = vld [vmem:[#allocation5 + $0x170] sm:$0xff]  }
  0x39   :  { %708 = vmatpush3.bf16.msra.mxu0 %v793_v18  ;;  %v827_v53 = vld [vmem:[#allocation5 + $0x130] sm:$0xff]   ;;  %v828_v54 = vld [vmem:[#allocation5 + $0x178] sm:$0xff]  }
  0x3a   :  { %709 = vmatprep.subr.bf16.mxu0 %v796_v21  ;;  %v829_v55 = vld [vmem:[#allocation5 + $0x138] sm:$0xff]   ;;  %v643_v58 = vld [vmem:[%s996_s3] ss:$0 sm:$0xff] }
  0x3b   :  { %730 = vmatpush3.bf16.msra.mxu1 %v795_v20  ;;  %v830_v56 = vld [vmem:[#allocation2 + $0x10] ss:$24 sps:$4 sm:$0xff]   ;;  %v698_v18 = vld [vmem:[%s997_s4] ss:$0 sm:$0xff] }
  0x3c   :  { %731 = vmatprep.subr.bf16.mxu1 %v798_v23  ;;  %162 = vperm.xlu0 %775, %v153_v51  }
  0x3d   :  { %710 = vmatpush3.bf16.msra.mxu0 %v797_v22 }
  0x3e   :  { %711 = vmatprep.subr.bf16.mxu0 %v800_v25 }
  0x3f   :  { %732 = vmatpush3.bf16.msra.mxu1 %v799_v24 }
  0x40   :  { %733 = vmatprep.subr.bf16.mxu1 %v802_v27 }
  0x41   :  { %712 = vmatpush3.bf16.msra.mxu0 %v801_v26 }
  0x42   :  { %713 = vmatprep.subr.bf16.mxu0 %v804_v29 }
  0x43   :  { %734 = vmatpush3.bf16.msra.mxu1 %v803_v28 }
  0x44   :  { %735 = vmatprep.subr.bf16.mxu1 %v806_v31 }
  0x45   :  { %714 = vmatpush3.bf16.msra.mxu0 %v805_v30 }
  0x46   :  { %743 = vmatprep.subr.bf16.mxu0 %v811_v35 }
  0x47   :  { %736 = vmatpush3.bf16.msra.mxu1 %v810_v34 }
  0x48   :  { %524 = vmatmul.mubr.bf16.vlgmr.msra.gmra.mrb[0].mxu0 %v807_v32 }
  0x49   :  { %744 = vmatpush3.bf16.msra.mxu0 %v815_v38  ;;  %605 = vmatprep.mubr.bf16.mxu0 %v832_v48 }
  0x4a   :  { %565 = vmatmul.mubr.bf16.vlgmr.msra.gmra.mrb[0].mxu1 %v812_v36  ;;  %745 = vmatprep.subr.bf16.mxu0 %v816_v39 }
  0x4d   :  { %746 = vmatpush3.bf16.msra.mxu0 %v817_v40 }
  0x4e   :  { %747 = vmatprep.subr.bf16.mxu0 %v818_v41 }
  0x51   :  { %748 = vmatpush3.bf16.msra.mxu0 %v819_v42 }
  0x52   :  { %749 = vmatprep.subr.bf16.mxu0 %v820_v43 }
  0x55   :  { %750 = vmatpush3.bf16.msra.mxu0 %v821_v44 }
  0x56   :  { %751 = vmatprep.subr.bf16.mxu0 %v822_v45 }
  0x59   :  { %752 = vmatpush3.bf16.msra.mxu0 %v823_v46 }
  0x5a   :  { %753 = vmatprep.subr.bf16.mxu0 %v824_v47 }
  0x5d   :  { %754 = vmatpush3.bf16.msra.mxu0 %v825_v50 }
  0x5e   :  { %755 = vmatprep.subr.bf16.mxu0 %v826_v52 }
  0x61   :  { %756 = vmatpush3.bf16.msra.mxu0 %v827_v53 }
  0x62   :  { %757 = vmatprep.subr.bf16.mxu0 %v828_v54 }
  0x65   :  { %758 = vmatpush3.bf16.msra.mxu0 %v829_v55 }
  0x68   :  { %606 = vmatmul.mubr.bf16.vlgmr.msra.gmra.mrb[4].mxu0 %v830_v56 }
  0xb7   :  { %v158_v57 = vpop.permute.xlu0 %157 }
  0xb8   :  { %v171_v60 = vmul.f32 %v643_v58, %v158_v57 }
  0xbb   :  { %v163_v59 = vpop.permute.xlu0 %162 }
  0xbc   :  { %v172_v1 = vmul.f32 %v643_v58, %v163_v59 }
 0x11b   :  { %v715_v61 = vpop.f32.mrb[0].mxu0 }
 0x11c   :  { %v716_v62 = vpop.f32.mrb[1].mxu0 }
 0x11d   :  { %v717_v63 = vadd.f32 %v716_v62, %v715_v61  ;;  %v718_v0 = vpop.f32.mrb[2].mxu0  ;;  %v737_v2 = vpop.f32.mrb[0].mxu1 }
 0x11e   :  { %v719_v3 = vpop.f32.mrb[3].mxu0  ;;  %v738_v6 = vpop.f32.mrb[1].mxu1 }
 0x11f   :  { %v526_v4 = vadd.f32 %v717_v63, %v171_v60  ;;  %v720_v5 = vadd.f32 %v719_v3, %v718_v0  ;;  %v739_v7 = vadd.f32 %v738_v6, %v737_v2  ;;  %v740_v8 = vpop.f32.mrb[2].mxu1 }
 0x120   :  { %v741_v10 = vpop.f32.mrb[3].mxu1 }
 0x121   :  { %v529_v9 = vadd.f32 %v720_v5, %v172_v1  ;;  %v567_v11 = vadd.f32 %v739_v7, %v526_v4  ;;  %v742_v12 = vadd.f32 %v741_v10, %v740_v8 }
 0x123   :  { %v570_v13 = vadd.f32 %v742_v12, %v529_v9 }
 0x13b   :  { %v759_v14 = vpop.f32.mrb[4].mxu0 }
 0x13c   :  { %v760_v15 = vpop.f32.mrb[5].mxu0 }
 0x13d   :  { %v761_v16 = vadd.f32 %v760_v15, %v759_v14  ;;  %v762_v17 = vpop.f32.mrb[6].mxu0 }
 0x13e   :  { %v763_v19 = vpop.f32.mrb[7].mxu0 }
 0x13f   :  { %v608_v20 = vadd.f32 %v761_v16, %v567_v11  ;;  %v764_v21 = vadd.f32 %v763_v19, %v762_v17 }
 0x141   :  { %v621_v22 = vadd.f32 %v698_v18, %v608_v20  ;;  %v611_v23 = vadd.f32 %v764_v21, %v570_v13 }
 0x143   :  { %623 = vst [vmem:[#allocation7] sm:$0xff] %v621_v22  ;;  %v622_v24 = vadd.f32 %v698_v18, %v611_v23 }
 0x145   :  { %624 = vst [vmem:[#allocation7 + $0x8] sm:$0xff] %v622_v24 }
 0x146   :  { %888 = shalt.err (!%p885_p6)
}
 0x147   :  { %s889_s29 = scalar_lea.hbm %s998_s5, 256 }
 0x148   :  { %p890_p7 = scmp.ne.s32.totalorder %s998_s5, %s889_s29  ;;  %p893_p8 = scmp.lt.u32.totalorder %s889_s29, %s998_s5 }
 0x14a   :  { %p895_p9 = pnand %p893_p8, %p890_p7 }
 0x14c   :  { %898 = shalt.err (!%p895_p9)
}
 0x14d   :  { %s913_s9 = smov 128   ;;  %s914_s10 = smov 8  }
 0x14e   :  { %636 = dma.vmem_to_hbm [thread:$0]  %s631_s26, 256, %s998_s5, [#allocation4], %s913_s9, %s913_s9, %s914_s10  }
 0x14f   :  { %903 = dma.done.wait [#allocation4], 256  }
 0x150   :  { %904 = vsyncadd [#allocation4], 4294967040 }
 0x151   :  { %640 = vsyncpa [#allocation3], 1 }
 0x152   :  { %641 = vsyncpa [#allocation6], 1 }
 0x153   :  { %642 = vsyncpa [#allocation4], 1 }

</bundles_post_ra>
